<compile_context>
chip_gen: v7x
topology: tpu7x:2x2x1
jax: 0.10.0
libtpu: 0.0.40
codegen_flags: <defaults>
</compile_context>

<pallas_src>
import functools

import jax
import jax.numpy as jnp
from jax import lax
from jax.experimental import pallas as pl
from jax.experimental.pallas import tpu as pltpu


HIDDEN = 64
_LANE = 128
_SUBLANE = 8
_VMEM_STEP_BUDGET = 8 * 1024 * 1024      # variable VMEM budget per grid step
_VMEM_LIMIT_BYTES = 32 * 1024 * 1024     # <= physical VMEM on v5e/v6e/v7x


def _round_up(x, m):
    return ((x + m - 1) // m) * m


def _per_element_vmem_bytes(n_nodes, input_dim, n_bond_orders, compute_bytes):
    """Rough per-batch-element VMEM footprint of one grid step (lane padded)."""
    rows = _round_up(n_nodes, _SUBLANE)
    in_blk = rows * _round_up(input_dim, _LANE) * compute_bytes
    out_blk = rows * _round_up(n_nodes * n_bond_orders, _LANE) * 4
    inter = rows * (
        _round_up(HIDDEN, _LANE) * (3 * 4 + 2 * compute_bytes)            # h1,h2,h
        + _round_up(n_bond_orders * HIDDEN, _LANE) * (4 + compute_bytes)  # hA
        + _round_up(n_nodes * n_bond_orders, _LANE) * 4                   # acc
        + _round_up(n_nodes, _LANE) * 4)                                  # bond_o
    # input and output blocks are double-buffered by the pipeline.
    return 2 * in_blk + 2 * out_blk + inter


def _pick_block_batch(bs, n_nodes, input_dim, n_bond_orders, compute_bytes,
                      min_grid_steps=1, vmem_budget=_VMEM_STEP_BUDGET):
    """Largest divisor of bs whose per-step footprint fits the VMEM budget.

    min_grid_steps=1 (default) lets nb=1 when everything fits — best for the
    single-TensorCore v5e/v6e.  Pass min_grid_steps=2 on v7x so both
    TensorCores get a share of the ('parallel') batch axis.
    """
    per_elem = max(1, _per_element_vmem_bytes(n_nodes, input_dim,
                                              n_bond_orders, compute_bytes))
    cap = max(1, min(bs, vmem_budget // per_elem))
    if min_grid_steps > 1:
        cap = max(1, min(cap, bs // min_grid_steps))
    for tb in range(cap, 0, -1):
        if bs % tb == 0:
            return tb
    return 1


def _quadratic_estimator_kernel(z_ref, w1_ref, b1_ref, w2_ref, b2_ref, a_ref,
                                perm_ref, out_ref, *, n_bond_orders, n_nodes,
                                tb, compute_dtype):
    # z_ref:   (tb, n, input_dim)  in compute_dtype
    # w1_ref:  (input_dim, H)      b1_ref: (1, H) f32
    # w2_ref:  (H, H)              b2_ref: (1, H) f32
    # a_ref:   (H, O*H)   symmetrized A, bond orders packed along lanes
    # perm_ref:(O*n, n*O) 0/1 permutation: row o*n+j has a 1 at column j*O+o
    # out_ref: (tb, n, n*O) f32    (already the final interleaved layout)
    d_in = z_ref.shape[-1]
    m = tb * n_nodes

    # ---- MLP: Linear -> SiLU -> Linear -> SiLU over the whole batch block.
    z = z_ref[...].reshape(m, d_in)                               # (tb*n, D)
    h1 = jnp.dot(z, w1_ref[...], preferred_element_type=jnp.float32) + b1_ref[...]
    h1 = h1 * jax.nn.sigmoid(h1)                                  # SiLU (f32)
    h2 = jnp.dot(h1.astype(compute_dtype), w2_ref[...],
                 preferred_element_type=jnp.float32) + b2_ref[...]
    h = h2 * jax.nn.sigmoid(h2)                                   # (tb*n, H) f32

    hq = h.astype(compute_dtype)
    h3 = hq.reshape(tb, n_nodes, HIDDEN)                          # (tb, n, H)

    # ---- Stage 1: all bond orders fused: (tb*n, H) @ (H, O*H) -> (tb*n, O*H)
    hA = jnp.dot(hq, a_ref[...], preferred_element_type=jnp.float32)
    perm = perm_ref[...]                                          # (O*n, n*O)

    # ---- Stage 2: per bond order, batched contraction over H, then one
    #      wide-M permutation matmul that drops the (tb, n, n) plane into its
    #      interleaved final columns (j*O + o) of the lane-dense accumulator.
    acc = jnp.zeros((m, n_nodes * n_bond_orders), jnp.float32)
    for o in range(n_bond_orders):                                # static, small
        hA_o = hA[:, o * HIDDEN:(o + 1) * HIDDEN]                 # static lane slice
        hA_o3 = hA_o.astype(compute_dtype).reshape(tb, n_nodes, HIDDEN)
        bond_o = lax.dot_general(
            hA_o3, h3,
            dimension_numbers=(((2,), (2,)), ((0,), (0,))),
            preferred_element_type=jnp.float32)                   # (tb, n, n)
        p_o = perm[o * n_nodes:(o + 1) * n_nodes, :]              # (n, n*O), 0/1
        acc = acc + jnp.dot(bond_o.reshape(m, n_nodes), p_o,      # exact scatter
                            preferred_element_type=jnp.float32)
    out_ref[...] = acc.reshape(tb, n_nodes, n_nodes * n_bond_orders)


def quadratic_estimator_forward(z_xh, params, *, compute_dtype=jnp.bfloat16,
                                block_batch=None, min_grid_steps=1):
    """z_xh: (bs, n_nodes, input_dim) -> (bs, n_nodes, n_nodes, O).

    compute_dtype: matmul-operand dtype (f32 accumulation everywhere).
    bfloat16 (default) targets the v6e/v7x bf16-native MXU; float32 is exact
    and v5e-friendly.
    """
    bs, n_nodes, input_dim = z_xh.shape
    A, w1, b1, w2, b2 = (params["A"], params["w1"], params["b1"],
                         params["w2"], params["b2"])
    n_bond_orders = A.shape[0]
    compute_bytes = jnp.dtype(compute_dtype).itemsize

    tb = (block_batch if block_batch is not None else
          _pick_block_batch(bs, n_nodes, input_dim, n_bond_orders,
                            compute_bytes, min_grid_steps=min_grid_steps))
    assert bs % tb == 0, "block_batch must divide the batch size"
    nb = bs // tb

    # Parameter glue (once, in XLA): symmetrize A, drop broadcast dim, pack
    # bond orders along lanes -> one wide stage-1 matmul in the kernel.
    A_sym = ((A + jnp.swapaxes(A, -1, -2)) * 0.5)[:, 0]           # (O, H, H)
    A_flat = jnp.transpose(A_sym, (1, 0, 2)).reshape(
        HIDDEN, n_bond_orders * HIDDEN).astype(compute_dtype)
    w1_c = w1.astype(compute_dtype)
    w2_c = w2.astype(compute_dtype)
    b1_2d = b1.reshape(1, HIDDEN).astype(jnp.float32)
    b2_2d = b2.reshape(1, HIDDEN).astype(jnp.float32)
    z_c = z_xh.astype(compute_dtype)

    # 0/1 permutation: row (o*n + j) -> column (j*O + o).  Kept in f32 so the
    # interleave matmul is exact (one nonzero per column).
    rows = jnp.arange(n_bond_orders * n_nodes)
    perm = jax.nn.one_hot((rows % n_nodes) * n_bond_orders + rows // n_nodes,
                          n_nodes * n_bond_orders, dtype=jnp.float32)

    kernel = functools.partial(_quadratic_estimator_kernel,
                               n_bond_orders=n_bond_orders, n_nodes=n_nodes,
                               tb=tb, compute_dtype=compute_dtype)

    mlp_flops = 2 * bs * n_nodes * (input_dim * HIDDEN + HIDDEN * HIDDEN)
    quad_flops = (2 * bs * n_nodes * HIDDEN * n_bond_orders * HIDDEN
                  + 2 * bs * n_bond_orders * n_nodes * n_nodes * HIDDEN
                  + 2 * bs * n_bond_orders * n_nodes * n_nodes
                  * n_nodes * n_bond_orders)
    bytes_accessed = (z_c.size * compute_bytes
                      + (w1_c.size + w2_c.size + A_flat.size) * compute_bytes
                      + (b1.size + b2.size + perm.size) * 4
                      + bs * n_nodes * n_nodes * n_bond_orders * 4)

    out = pl.pallas_call(
        kernel,
        out_shape=jax.ShapeDtypeStruct(
            (bs, n_nodes, n_nodes * n_bond_orders), jnp.float32),
        grid_spec=pltpu.PrefetchScalarGridSpec(
            num_scalar_prefetch=0,
            grid=(nb,),
            in_specs=[
                pl.BlockSpec((tb, n_nodes, input_dim), lambda b: (b, 0, 0)),
                pl.BlockSpec((input_dim, HIDDEN), lambda b: (0, 0)),
                pl.BlockSpec((1, HIDDEN), lambda b: (0, 0)),
                pl.BlockSpec((HIDDEN, HIDDEN), lambda b: (0, 0)),
                pl.BlockSpec((1, HIDDEN), lambda b: (0, 0)),
                pl.BlockSpec((HIDDEN, n_bond_orders * HIDDEN),
                             lambda b: (0, 0)),
                pl.BlockSpec((n_bond_orders * n_nodes,
                              n_nodes * n_bond_orders), lambda b: (0, 0)),
            ],
            out_specs=pl.BlockSpec(
                (tb, n_nodes, n_nodes * n_bond_orders), lambda b: (b, 0, 0)),
        ),
        compiler_params=pltpu.CompilerParams(
            dimension_semantics=("parallel",),
            vmem_limit_bytes=_VMEM_LIMIT_BYTES),
        cost_estimate=pl.CostEstimate(flops=mlp_flops + quad_flops,
                                      transcendentals=2 * bs * n_nodes * HIDDEN,
                                      bytes_accessed=bytes_accessed),
    )(z_c, w1_c, b1_2d, w2_c, b2_2d, A_flat, perm)

    # Pure reshape (no transpose / extra HBM pass): lanes are already (j, o).
    return out.reshape(bs, n_nodes, n_nodes, n_bond_orders)


def init_params(key, input_dim, n_bond_orders):
    kA, k1, kb1, k2, kb2 = jax.random.split(key, 5)
    A = jax.random.normal(kA, (n_bond_orders, 1, HIDDEN, HIDDEN), jnp.float32)
    lim1 = 1.0 / jnp.sqrt(input_dim)
    lim2 = 1.0 / jnp.sqrt(HIDDEN)
    # Stored as (in, out) so the kernel computes x @ W + b (== PyTorch x @ W^T + b).
    w1 = jax.random.uniform(k1, (input_dim, HIDDEN), jnp.float32, -lim1, lim1)
    b1 = jax.random.uniform(kb1, (HIDDEN,), jnp.float32, -lim1, lim1)
    w2 = jax.random.uniform(k2, (HIDDEN, HIDDEN), jnp.float32, -lim2, lim2)
    b2 = jax.random.uniform(kb2, (HIDDEN,), jnp.float32, -lim2, lim2)
    return {"A": A, "w1": w1, "b1": b1, "w2": w2, "b2": b2}


def reference_forward(z_xh, params):
    """Plain-JAX reference matching the PyTorch module."""
    A, w1, b1, w2, b2 = (params["A"], params["w1"], params["b1"],
                         params["w2"], params["b2"])
    h = z_xh @ w1 + b1
    h = h * jax.nn.sigmoid(h)
    h = h @ w2 + b2
    h = h * jax.nn.sigmoid(h)                                    # (bs, n, H)
    A_sym = (A + jnp.swapaxes(A, -1, -2)) / 2                    # (O, 1, H, H)
    bond = h[None] @ A_sym @ jnp.swapaxes(h, -1, -2)[None]       # (O, bs, n, n)
    return jnp.moveaxis(bond, 0, -1)                             # (bs, n, n, O)


if __name__ == "__main__":
    key = jax.random.PRNGKey(0)
    k_param, k_in = jax.random.split(key)

    bs, n_nodes, input_dim, n_bond_orders = 2, 8, 16, 4
    params = init_params(k_param, input_dim, n_bond_orders)
    z_xh = jax.random.normal(k_in, (bs, n_nodes, input_dim), jnp.float32)

    ref = reference_forward(z_xh, params)

    # Default path: bf16 matmul operands, f32 accumulation (v6e/v7x MXU).
    out_bf16 = jax.block_until_ready(quadratic_estimator_forward(z_xh, params))
    assert out_bf16.shape == (bs, n_nodes, n_nodes, n_bond_orders)
    assert jnp.allclose(out_bf16, ref, atol=1e-1, rtol=1e-1)

    # Exact path: f32 operands everywhere (v5e-friendly).
    out_f32 = jax.block_until_ready(
        quadratic_estimator_forward(z_xh, params, compute_dtype=jnp.float32))
    assert out_f32.shape == (bs, n_nodes, n_nodes, n_bond_orders)
    assert jnp.allclose(out_f32, ref, atol=2e-3, rtol=2e-3)

    print("KERNEL_OK")
</pallas_src>

<mosaic_0001>
module attributes {stable_mosaic.version = 11 : i64} {
  func.func @_quadratic_estimator_kernel(%arg0: i32, %arg1: memref<2x8x16xbf16, #tpu.memory_space<vmem>>, %arg2: memref<16x64xbf16, #tpu.memory_space<vmem>>, %arg3: memref<1x64xf32, #tpu.memory_space<vmem>>, %arg4: memref<64x64xbf16, #tpu.memory_space<vmem>>, %arg5: memref<1x64xf32, #tpu.memory_space<vmem>>, %arg6: memref<64x256xbf16, #tpu.memory_space<vmem>>, %arg7: memref<32x32xf32, #tpu.memory_space<vmem>>, %arg8: memref<2x8x32xf32, #tpu.memory_space<vmem>>) attributes {dimension_semantics = [#tpu.dimension_semantics<parallel>], iteration_bounds = array<i64: 1>, scalar_prefetch = 0 : i64, scratch_operands = 0 : i64, tpu.core_type = #tpu.core_type<tc>, window_params = [{transform_indices = @transform_0, window_bounds = array<i64: 2, 8, 16>}, {pipeline_mode = #tpu.pipeline_mode<synchronous>, transform_indices = @transform_1, window_bounds = array<i64: 16, 64>}, {pipeline_mode = #tpu.pipeline_mode<synchronous>, transform_indices = @transform_2, window_bounds = array<i64: 1, 64>}, {pipeline_mode = #tpu.pipeline_mode<synchronous>, transform_indices = @transform_3, window_bounds = array<i64: 64, 64>}, {pipeline_mode = #tpu.pipeline_mode<synchronous>, transform_indices = @transform_4, window_bounds = array<i64: 1, 64>}, {pipeline_mode = #tpu.pipeline_mode<synchronous>, transform_indices = @transform_5, window_bounds = array<i64: 64, 256>}, {pipeline_mode = #tpu.pipeline_mode<synchronous>, transform_indices = @transform_6, window_bounds = array<i64: 32, 32>}, {transform_indices = @transform_7, window_bounds = array<i64: 2, 8, 32>}]} {
    %c0 = arith.constant 0 : index
    %c0_0 = arith.constant 0 : index
    %c0_1 = arith.constant 0 : index
    %0 = vector.load %arg1[%c0, %c0_0, %c0_1] : memref<2x8x16xbf16, #tpu.memory_space<vmem>>, vector<2x8x16xbf16>
    %1 = vector.shape_cast %0 : vector<2x8x16xbf16> to vector<16x16xbf16>
    %c0_2 = arith.constant 0 : index
    %c0_3 = arith.constant 0 : index
    %2 = vector.load %arg2[%c0_2, %c0_3] : memref<16x64xbf16, #tpu.memory_space<vmem>>, vector<16x64xbf16>
    %cst = arith.constant dense<0.000000e+00> : vector<16x64xf32>
    %3 = tpu.matmul %1, %2, %cst {dimension_numbers = #tpu.dot_dimension_numbers<[1], [0], [0], [1], [0, 0, 1, 1], [], []>} : vector<16x16xbf16>, vector<16x64xbf16>, vector<16x64xf32> -> vector<16x64xf32>
    %c0_4 = arith.constant 0 : index
    %c0_5 = arith.constant 0 : index
    %4 = vector.load %arg3[%c0_4, %c0_5] : memref<1x64xf32, #tpu.memory_space<vmem>>, vector<1x64xf32>
    %5 = vector.broadcast %4 : vector<1x64xf32> to vector<16x64xf32>
    %6 = arith.addf %3, %5 : vector<16x64xf32>
    %7 = arith.negf %6 : vector<16x64xf32>
    %8 = math.exp %7 : vector<16x64xf32>
    %cst_6 = arith.constant 1.000000e+00 : f32
    %9 = vector.broadcast %cst_6 : f32 to vector<16x64xf32>
    %10 = arith.addf %9, %8 : vector<16x64xf32>
    %11 = arith.divf %9, %10 : vector<16x64xf32>
    %12 = arith.mulf %6, %11 : vector<16x64xf32>
    %13 = arith.truncf %12 : vector<16x64xf32> to vector<16x64xbf16>
    %c0_7 = arith.constant 0 : index
    %c0_8 = arith.constant 0 : index
    %14 = vector.load %arg4[%c0_7, %c0_8] : memref<64x64xbf16, #tpu.memory_space<vmem>>, vector<64x64xbf16>
    %cst_9 = arith.constant dense<0.000000e+00> : vector<16x64xf32>
    %15 = tpu.matmul %13, %14, %cst_9 {dimension_numbers = #tpu.dot_dimension_numbers<[1], [0], [0], [1], [0, 0, 1, 1], [], []>} : vector<16x64xbf16>, vector<64x64xbf16>, vector<16x64xf32> -> vector<16x64xf32>
    %c0_10 = arith.constant 0 : index
    %c0_11 = arith.constant 0 : index
    %16 = vector.load %arg5[%c0_10, %c0_11] : memref<1x64xf32, #tpu.memory_space<vmem>>, vector<1x64xf32>
    %17 = vector.broadcast %16 : vector<1x64xf32> to vector<16x64xf32>
    %18 = arith.addf %15, %17 : vector<16x64xf32>
    %19 = arith.negf %18 : vector<16x64xf32>
    %20 = math.exp %19 : vector<16x64xf32>
    %cst_12 = arith.constant 1.000000e+00 : f32
    %21 = vector.broadcast %cst_12 : f32 to vector<16x64xf32>
    %22 = arith.addf %21, %20 : vector<16x64xf32>
    %23 = arith.divf %21, %22 : vector<16x64xf32>
    %24 = arith.mulf %18, %23 : vector<16x64xf32>
    %25 = arith.truncf %24 : vector<16x64xf32> to vector<16x64xbf16>
    %26 = vector.shape_cast %25 : vector<16x64xbf16> to vector<2x8x64xbf16>
    %c0_13 = arith.constant 0 : index
    %c0_14 = arith.constant 0 : index
    %27 = vector.load %arg6[%c0_13, %c0_14] : memref<64x256xbf16, #tpu.memory_space<vmem>>, vector<64x256xbf16>
    %cst_15 = arith.constant dense<0.000000e+00> : vector<16x256xf32>
    %28 = tpu.matmul %25, %27, %cst_15 {dimension_numbers = #tpu.dot_dimension_numbers<[1], [0], [0], [1], [0, 0, 1, 1], [], []>} : vector<16x64xbf16>, vector<64x256xbf16>, vector<16x256xf32> -> vector<16x256xf32>
    %c0_16 = arith.constant 0 : index
    %c0_17 = arith.constant 0 : index
    %29 = vector.load %arg7[%c0_16, %c0_17] : memref<32x32xf32, #tpu.memory_space<vmem>>, vector<32x32xf32>
    %cst_18 = arith.constant 0.000000e+00 : f32
    %30 = vector.broadcast %cst_18 : f32 to vector<16x32xf32>
    %31 = vector.extract_strided_slice %28 {offsets = [0, 0], sizes = [16, 64], strides = [1, 1]} : vector<16x256xf32> to vector<16x64xf32>
    %32 = arith.truncf %31 : vector<16x64xf32> to vector<16x64xbf16>
    %33 = vector.shape_cast %32 : vector<16x64xbf16> to vector<2x8x64xbf16>
    %cst_19 = arith.constant dense<0.000000e+00> : vector<2x8x8xf32>
    %34 = tpu.matmul %33, %26, %cst_19 {dimension_numbers = #tpu.dot_dimension_numbers<[2], [2], [1], [1], [0, 0, 0, 1, 1, 1], [0], [0]>} : vector<2x8x64xbf16>, vector<2x8x64xbf16>, vector<2x8x8xf32> -> vector<2x8x8xf32>
    %35 = vector.extract_strided_slice %29 {offsets = [0, 0], sizes = [8, 32], strides = [1, 1]} : vector<32x32xf32> to vector<8x32xf32>
    %36 = vector.shape_cast %34 : vector<2x8x8xf32> to vector<16x8xf32>
    %cst_20 = arith.constant dense<0.000000e+00> : vector<16x32xf32>
    %37 = tpu.matmul %36, %35, %cst_20 {dimension_numbers = #tpu.dot_dimension_numbers<[1], [0], [0], [1], [0, 0, 1, 1], [], []>} : vector<16x8xf32>, vector<8x32xf32>, vector<16x32xf32> -> vector<16x32xf32>
    %38 = arith.addf %30, %37 : vector<16x32xf32>
    %39 = vector.extract_strided_slice %28 {offsets = [0, 64], sizes = [16, 64], strides = [1, 1]} : vector<16x256xf32> to vector<16x64xf32>
    %40 = arith.truncf %39 : vector<16x64xf32> to vector<16x64xbf16>
    %41 = vector.shape_cast %40 : vector<16x64xbf16> to vector<2x8x64xbf16>
    %cst_21 = arith.constant dense<0.000000e+00> : vector<2x8x8xf32>
    %42 = tpu.matmul %41, %26, %cst_21 {dimension_numbers = #tpu.dot_dimension_numbers<[2], [2], [1], [1], [0, 0, 0, 1, 1, 1], [0], [0]>} : vector<2x8x64xbf16>, vector<2x8x64xbf16>, vector<2x8x8xf32> -> vector<2x8x8xf32>
    %43 = vector.extract_strided_slice %29 {offsets = [8, 0], sizes = [8, 32], strides = [1, 1]} : vector<32x32xf32> to vector<8x32xf32>
    %44 = vector.shape_cast %42 : vector<2x8x8xf32> to vector<16x8xf32>
    %cst_22 = arith.constant dense<0.000000e+00> : vector<16x32xf32>
    %45 = tpu.matmul %44, %43, %cst_22 {dimension_numbers = #tpu.dot_dimension_numbers<[1], [0], [0], [1], [0, 0, 1, 1], [], []>} : vector<16x8xf32>, vector<8x32xf32>, vector<16x32xf32> -> vector<16x32xf32>
    %46 = arith.addf %38, %45 : vector<16x32xf32>
    %47 = vector.extract_strided_slice %28 {offsets = [0, 128], sizes = [16, 64], strides = [1, 1]} : vector<16x256xf32> to vector<16x64xf32>
    %48 = arith.truncf %47 : vector<16x64xf32> to vector<16x64xbf16>
    %49 = vector.shape_cast %48 : vector<16x64xbf16> to vector<2x8x64xbf16>
    %cst_23 = arith.constant dense<0.000000e+00> : vector<2x8x8xf32>
    %50 = tpu.matmul %49, %26, %cst_23 {dimension_numbers = #tpu.dot_dimension_numbers<[2], [2], [1], [1], [0, 0, 0, 1, 1, 1], [0], [0]>} : vector<2x8x64xbf16>, vector<2x8x64xbf16>, vector<2x8x8xf32> -> vector<2x8x8xf32>
    %51 = vector.extract_strided_slice %29 {offsets = [16, 0], sizes = [8, 32], strides = [1, 1]} : vector<32x32xf32> to vector<8x32xf32>
    %52 = vector.shape_cast %50 : vector<2x8x8xf32> to vector<16x8xf32>
    %cst_24 = arith.constant dense<0.000000e+00> : vector<16x32xf32>
    %53 = tpu.matmul %52, %51, %cst_24 {dimension_numbers = #tpu.dot_dimension_numbers<[1], [0], [0], [1], [0, 0, 1, 1], [], []>} : vector<16x8xf32>, vector<8x32xf32>, vector<16x32xf32> -> vector<16x32xf32>
    %54 = arith.addf %46, %53 : vector<16x32xf32>
    %55 = vector.extract_strided_slice %28 {offsets = [0, 192], sizes = [16, 64], strides = [1, 1]} : vector<16x256xf32> to vector<16x64xf32>
    %56 = arith.truncf %55 : vector<16x64xf32> to vector<16x64xbf16>
    %57 = vector.shape_cast %56 : vector<16x64xbf16> to vector<2x8x64xbf16>
    %cst_25 = arith.constant dense<0.000000e+00> : vector<2x8x8xf32>
    %58 = tpu.matmul %57, %26, %cst_25 {dimension_numbers = #tpu.dot_dimension_numbers<[2], [2], [1], [1], [0, 0, 0, 1, 1, 1], [0], [0]>} : vector<2x8x64xbf16>, vector<2x8x64xbf16>, vector<2x8x8xf32> -> vector<2x8x8xf32>
    %59 = vector.extract_strided_slice %29 {offsets = [24, 0], sizes = [8, 32], strides = [1, 1]} : vector<32x32xf32> to vector<8x32xf32>
    %60 = vector.shape_cast %58 : vector<2x8x8xf32> to vector<16x8xf32>
    %cst_26 = arith.constant dense<0.000000e+00> : vector<16x32xf32>
    %61 = tpu.matmul %60, %59, %cst_26 {dimension_numbers = #tpu.dot_dimension_numbers<[1], [0], [0], [1], [0, 0, 1, 1], [], []>} : vector<16x8xf32>, vector<8x32xf32>, vector<16x32xf32> -> vector<16x32xf32>
    %62 = arith.addf %54, %61 : vector<16x32xf32>
    %63 = vector.shape_cast %62 : vector<16x32xf32> to vector<2x8x32xf32>
    %c0_27 = arith.constant 0 : index
    %c0_28 = arith.constant 0 : index
    %c0_29 = arith.constant 0 : index
    %64 = vector.load %arg8[%c0_27, %c0_28, %c0_29] : memref<2x8x32xf32, #tpu.memory_space<vmem>>, vector<2x8x32xf32>
    tpu.vector_store %arg8[%c0_27, %c0_28, %c0_29], %63 {strides = array<i32>} : memref<2x8x32xf32, #tpu.memory_space<vmem>>, vector<2x8x32xf32>,
    return
  }
  func.func @transform_0(%arg0: i32) -> (i32, i32, i32) {
    %c0_i32 = arith.constant 0 : i32
    %c0_i32_0 = arith.constant 0 : i32
    %c0_i32_1 = arith.constant 0 : i32
    return %arg0, %c0_i32, %c0_i32_0 : i32, i32, i32
  }
  func.func @transform_1(%arg0: i32) -> (i32, i32) {
    %c0_i32 = arith.constant 0 : i32
    %c0_i32_0 = arith.constant 0 : i32
    %c0_i32_1 = arith.constant 0 : i32
    return %c0_i32, %c0_i32_0 : i32, i32
  }
  func.func @transform_2(%arg0: i32) -> (i32, i32) {
    %c0_i32 = arith.constant 0 : i32
    %c0_i32_0 = arith.constant 0 : i32
    %c0_i32_1 = arith.constant 0 : i32
    return %c0_i32, %c0_i32_0 : i32, i32
  }
  func.func @transform_3(%arg0: i32) -> (i32, i32) {
    %c0_i32 = arith.constant 0 : i32
    %c0_i32_0 = arith.constant 0 : i32
    %c0_i32_1 = arith.constant 0 : i32
    return %c0_i32, %c0_i32_0 : i32, i32
  }
  func.func @transform_4(%arg0: i32) -> (i32, i32) {
    %c0_i32 = arith.constant 0 : i32
    %c0_i32_0 = arith.constant 0 : i32
    %c0_i32_1 = arith.constant 0 : i32
    return %c0_i32, %c0_i32_0 : i32, i32
  }
  func.func @transform_5(%arg0: i32) -> (i32, i32) {
    %c0_i32 = arith.constant 0 : i32
    %c0_i32_0 = arith.constant 0 : i32
    %c0_i32_1 = arith.constant 0 : i32
    return %c0_i32, %c0_i32_0 : i32, i32
  }
  func.func @transform_6(%arg0: i32) -> (i32, i32) {
    %c0_i32 = arith.constant 0 : i32
    %c0_i32_0 = arith.constant 0 : i32
    %c0_i32_1 = arith.constant 0 : i32
    return %c0_i32, %c0_i32_0 : i32, i32
  }
  func.func @transform_7(%arg0: i32) -> (i32, i32, i32) {
    %c0_i32 = arith.constant 0 : i32
    %c0_i32_0 = arith.constant 0 : i32
    %c0_i32_1 = arith.constant 0 : i32
    return %arg0, %c0_i32, %c0_i32_0 : i32, i32, i32
  }
}

</mosaic_0001>

<bundles_post_ra>
// kernel: tpu_custom_call.1
= control target key start
LH: loop header
LB: loop body
LE: loop exit
PB: predicated region body
PF: predicated region fallthrough
CT: control target
= control target key end

     0   :  { %12 = vsyncpa [#allocation3], 0  ;;  %s1692_s0 = inlined_call_operand.hbm [shape: bf16[2,8,16], index: 0, kind: input, shape index: {}]   ;;  %s1693_s1 = inlined_call_operand.hbm [shape: bf16[16,64], index: 1, kind: input, shape index: {}]   ;;  %s1694_s2 = inlined_call_operand.vmem [shape: f32[1,64], index: 2, kind: input, shape index: {}]   ;;  %s1695_s3 = inlined_call_operand.hbm [shape: bf16[64,64], index: 3, kind: input, shape index: {}]   ;;  %s1696_s4 = inlined_call_operand.vmem [shape: f32[1,64], index: 4, kind: input, shape index: {}]   ;;  %s1697_s5 = inlined_call_operand.hbm [shape: bf16[64,256], index: 5, kind: input, shape index: {}]   ;;  %s1698_s6 = inlined_call_operand.hbm [shape: f32[32,32], index: 6, kind: input, shape index: {}]   ;;  %s1699_s7 = inlined_call_operand.hbm [shape: f32[2,8,32], index: 7, kind: output, shape index: {}]  }
   0x1   :  { %13 = vsyncpa [#allocation6], 0 }
   0x2   :  { %14 = vsyncpa [#allocation9], 0 }
   0x3   :  { %15 = vsyncpa [#allocation4], 0  ;;  %s1466_s24 = smov [#allocation5]   ;;  %s1467_s26 = smov [#allocation8]  }
   0x4   :  { %s33_s25 = sshll.u32 %s1466_s24, 4  ;;  %s61_s27 = sshll.u32 %s1467_s26, 4  ;;  %s34_s25 = int_to_ptr.vmem [resolvable:$true] %s33_s25  ;;  %s1519_s27 = int_to_ptr.vmem [resolvable:$true] %s61_s27 }
   0x5   :  { %s1326_s30 = scalar_lea.hbm %s1693_s1, 128 }
   0x6   :  { %p1327_p0 = scmp.ne.s32.totalorder %s1693_s1, %s1326_s30  ;;  %p1330_p1 = scmp.lt.u32.totalorder %s1326_s30, %s1693_s1 }
   0x8   :  { %p1332_p2 = pnand %p1330_p1, %p1327_p0 }
   0xa   :  { %1335 = shalt.err (!%p1332_p2)
}
   0xb   :  { %s1336_s12 = scalar_lea.vmem %s34_s25, 128  ;;  %p1341_p4 = scmp.lt.s32.totalorder %s34_s25, %s34_s25 }
   0xc   :  { %p1337_p3 = scmp.ne.s32.totalorder %s34_s25, %s1336_s12  ;;  %p1342_p5 = scmp.lt.s32.totalorder %s1336_s12, %s1336_s12 }
   0xe   :  { %p1343_p6 = por %p1342_p5, %p1341_p4 }
  0x10   :  { %p1344_p7 = pnand %p1343_p6, %p1337_p3 }
  0x12   :  { %1347 = shalt.err (!%p1344_p7)
}
  0x13   :  { %s1468_s13 = smov 64   ;;  %s1469_s14 = smov 4  }
  0x14   :  { %39 = dma.hbm_to_vmem [thread:$0]  %s1693_s1, 128, %s34_s25, [#allocation6], %s1468_s13, %s1468_s13, %s1469_s14  }
  0x15   :  { %s1348_s19 = scalar_lea.hbm %s1697_s5, 1024 }
  0x16   :  { %p1349_p8 = scmp.ne.s32.totalorder %s1697_s5, %s1348_s19  ;;  %p1352_p9 = scmp.lt.u32.totalorder %s1348_s19, %s1697_s5 }
  0x18   :  { %p1354_p10 = pnand %p1352_p9, %p1349_p8 }
  0x1a   :  { %1357 = shalt.err (!%p1354_p10)
}
  0x1b   :  { %s1358_s24 = scalar_lea.vmem %s1519_s27, 1024  ;;  %p1363_p12 = scmp.lt.s32.totalorder %s1519_s27, %s1519_s27 }
  0x1c   :  { %p1359_p11 = scmp.ne.s32.totalorder %s1519_s27, %s1358_s24  ;;  %p1364_p13 = scmp.lt.s32.totalorder %s1358_s24, %s1358_s24 }
  0x1e   :  { %p1365_p0 = por %p1364_p13, %p1363_p12 }
  0x20   :  { %p1366_p1 = pnand %p1365_p0, %p1359_p11 }
  0x22   :  { %1369 = shalt.err (!%p1366_p1)
}
  0x23   :  { %s1470_s1 = smov 128   ;;  %s1471_s25 = smov 8  }
  0x24   :  { %67 = dma.hbm_to_vmem [thread:$0]  %s1697_s5, 1024, %s1519_s27, [#allocation9], %s1470_s1, %s1470_s1, %s1471_s25  }
  0x25   :  { %s1472_s29 = smov [#allocation2]   ;;  %s1473_s8 = smov [#allocation7]  }
  0x26   :  { %s21_s30 = sshll.u32 %s1472_s29, 4  ;;  %s47_s9 = sshll.u32 %s1473_s8, 4  ;;  %s22_s30 = int_to_ptr.vmem [resolvable:$true] %s21_s30  ;;  %s1556_s9 = int_to_ptr.vmem [resolvable:$true] %s47_s9 }
  0x27   :  { %s1370_s12 = scalar_lea.hbm %s1692_s0, 128 }
  0x28   :  { %p1371_p2 = scmp.ne.s32.totalorder %s1692_s0, %s1370_s12  ;;  %p1374_p3 = scmp.lt.u32.totalorder %s1370_s12, %s1692_s0 }
  0x2a   :  { %p1376_p4 = pnand %p1374_p3, %p1371_p2 }
  0x2c   :  { %1379 = shalt.err (!%p1376_p4)
}
  0x2d   :  { %s1380_s5 = scalar_lea.vmem %s22_s30, 128  ;;  %p1385_p6 = scmp.lt.s32.totalorder %s22_s30, %s22_s30 }
  0x2e   :  { %p1381_p5 = scmp.ne.s32.totalorder %s22_s30, %s1380_s5  ;;  %p1386_p7 = scmp.lt.s32.totalorder %s1380_s5, %s1380_s5 }
  0x30   :  { %p1387_p8 = por %p1386_p7, %p1385_p6 }
  0x32   :  { %p1388_p9 = pnand %p1387_p8, %p1381_p5 }
  0x34   :  { %1391 = shalt.err (!%p1388_p9)
}
  0x35   :  { %27 = dma.hbm_to_vmem [thread:$0]  %s1692_s0, 128, %s22_s30, [#allocation3], %s1468_s13, %s1468_s13, %s1469_s14  }
  0x36   :  { %s1392_s22 = scalar_lea.hbm %s1695_s3, 512 }
  0x37   :  { %p1393_p10 = scmp.ne.s32.totalorder %s1695_s3, %s1392_s22  ;;  %p1396_p11 = scmp.lt.u32.totalorder %s1392_s22, %s1695_s3 }
  0x39   :  { %p1398_p12 = pnand %p1396_p11, %p1393_p10 }
  0x3b   :  { %1401 = shalt.err (!%p1398_p12)
}
  0x3c   :  { %s1402_s29 = scalar_lea.vmem %s1556_s9, 512  ;;  %p1407_p0 = scmp.lt.s32.totalorder %s1556_s9, %s1556_s9 }
  0x3d   :  { %p1403_p13 = scmp.ne.s32.totalorder %s1556_s9, %s1402_s29  ;;  %p1408_p1 = scmp.lt.s32.totalorder %s1402_s29, %s1402_s29 }
  0x3f   :  { %p1409_p2 = por %p1408_p1, %p1407_p0 }
  0x41   :  { %p1410_p3 = pnand %p1409_p2, %p1403_p13 }
  0x43   :  { %1413 = shalt.err (!%p1410_p3)
}
  0x44   :  { %53 = dma.hbm_to_vmem [thread:$0]  %s1695_s3, 512, %s1556_s9, [#allocation6], %s1468_s13, %s1468_s13, %s1469_s14  }
  0x45   :  { %s1474_s8 = smov [#allocation10]   ;;  %s1414_s15 = scalar_lea.hbm %s1698_s6, 512 }
  0x46   :  { %s73_s10 = sshll.u32 %s1474_s8, 4  ;;  %p1415_p4 = scmp.ne.s32.totalorder %s1698_s6, %s1414_s15  ;;  %s74_s10 = int_to_ptr.vmem [resolvable:$true] %s73_s10 }
  0x47   :  { %p1418_p5 = scmp.lt.u32.totalorder %s1414_s15, %s1698_s6 }
  0x49   :  { %p1420_p6 = pnand %p1418_p5, %p1415_p4 }
  0x4b   :  { %1423 = shalt.err (!%p1420_p6)
}
  0x4c   :  { %s1424_s27 = scalar_lea.vmem %s74_s10, 512  ;;  %p1429_p8 = scmp.lt.s32.totalorder %s74_s10, %s74_s10 }
  0x4d   :  { %p1425_p7 = scmp.ne.s32.totalorder %s74_s10, %s1424_s27  ;;  %p1430_p9 = scmp.lt.s32.totalorder %s1424_s27, %s1424_s27 }
  0x4f   :  { %p1431_p10 = por %p1430_p9, %p1429_p8 }
  0x51   :  { %p1432_p11 = pnand %p1431_p10, %p1425_p7 }
  0x53   :  { %1435 = shalt.err (!%p1432_p11)
}
  0x54   :  { %79 = dma.hbm_to_vmem [thread:$0]  %s1698_s6, 512, %s74_s10, [#allocation9], %s1470_s1, %s1470_s1, %s1471_s25  }
  0x55   :  { %1458 = dma.done.wait [#allocation3], 128  }
  0x56   :  { %1459 = vsyncadd [#allocation3], 4294967168 }
  0x57   :  { %1460 = dma.done.wait [#allocation6], 640  }
  0x58   :  { %1461 = vsyncadd [#allocation6], 4294966656 }
  0x59   :  { %1462 = dma.done.wait [#allocation9], 1536  }
  0x5a   :  { %1463 = vsyncadd [#allocation9], 4294965760  ;;  %v1475_v0 = vmov 0.0   ;;  %vm1476_vm0 = vmmov 0   ;;  %v1292_v1 = vld [vmem:[#allocation5] sm:$0xff]   ;;  %v1293_v2 = vld [vmem:[#allocation2] sm:$0xff]  }
  0x5b   :  { %1187 = vmatprep.subr.bf16.mxu0 %v1475_v0  ;;  %1189 = vmatprep.mubr.msk.bf16.mxu0 %vm1476_vm0, %v1475_v0  ;;  %vm118_vm1 = vcmask 130048   ;;  %v1294_v3 = vld [vmem:[#allocation7] sm:$0xff]   ;;  %v1295_v4 = vld [vmem:[#allocation7 + $0x8] sm:$0xff]   ;;  %v1296_v5 = vld [vmem:[#allocation7 + $0x10] sm:$0xff]   ;;  %vm217_vm2 = vcmask 523264   ;;  %v1477_v33 = vmov 0  }
  0x5c   :  { %1193 = vmatprep.subr.bf16.mxu1 %v1475_v0  ;;  %1201 = vmatprep.mubr.msk.bf16.mxu1 %vm1476_vm0, %v1475_v0  ;;  %v1297_v6 = vld [vmem:[#allocation7 + $0x18] sm:$0xff]   ;;  %v1101_v7 = vld [vmem:[%s1694_s2] ss:$0 sm:$0xff]  ;;  %v1300_v25 = vld [vmem:[#allocation8 + $0x4] ss:$8 sps:$4 sm:$0xff]   ;;  %vm568_vm3 = vcmask 64512  }
  0x5d   :  { %1188 = vmatpush3.bf16.msra.mxu0 %v1292_v1  ;;  %1194 = vmatpush3.bf16.msra.mxu1 %v1294_v3  ;;  %v1298_v26 = vld [vmem:[#allocation8] ss:$8 sps:$4 sm:$0xff]   ;;  %v1303_v27 = vld [vmem:[#allocation8 + $0x14] ss:$8 sps:$4 sm:$0xff]   ;;  %v1301_v28 = vld [vmem:[#allocation8 + $0x10] ss:$8 sps:$4 sm:$0xff]  }
  0x5e   :  { %1195 = vmatprep.subr.bf16.mxu1 %v1475_v0  ;;  %333 = vmatprep.subr.bf16.mxu0 %v1300_v25  ;;  %v1306_v29 = vld [vmem:[#allocation8 + $0x24] ss:$8 sps:$4 sm:$0xff]   ;;  %v1304_v30 = vld [vmem:[#allocation8 + $0x20] ss:$8 sps:$4 sm:$0xff]   ;;  %v1309_v31 = vld [vmem:[#allocation8 + $0x34] ss:$8 sps:$4 sm:$0xff]  }
  0x5f   :  { %v1307_v32 = vld [vmem:[#allocation8 + $0x30] ss:$8 sps:$4 sm:$0xff]   ;;  %v377_v1 = vld [vmem:[#allocation10 + $0x8] sm:$0xff]  ;;  %vm1079_vm4 = vcmask 261120  }
  0x60   :  { %1190 = vmatmul.mubr.msk.bf16.vlgmr.msra.gmra.mrb[0].mxu0 %vm118_vm1, %v1293_v2  ;;  %v1107_v34 = vld [vmem:[%s1696_s4] ss:$0 sm:$0xff]  ;;  %s1478_s4 = smov [#allocation11]  }
  0x61   :  { %1196 = vmatpush3.bf16.msra.mxu1 %v1295_v4  ;;  %334 = vmatpush1.bf16.msra.mxu0 %v1298_v26 }
  0x62   :  { %1197 = vmatprep.subr.bf16.mxu1 %v1475_v0  ;;  %335 = vmatprep.subr.bf16.mxu0 %v1303_v27 }
  0x63   :  { %365 = vmatprep.mubr.bf16.mxu0 %v1477_v33 }
  0x65   :  { %1198 = vmatpush3.bf16.msra.mxu1 %v1296_v5  ;;  %336 = vmatpush1.bf16.msra.mxu0 %v1301_v28 }
  0x66   :  { %1199 = vmatprep.subr.bf16.mxu1 %v1475_v0  ;;  %337 = vmatprep.subr.bf16.mxu0 %v1306_v29  ;;  %v379_v29 = vld [vmem:[#allocation10 + $0x18] sm:$0xff] }
  0x69   :  { %1200 = vmatpush3.bf16.msra.mxu1 %v1297_v6  ;;  %338 = vmatpush1.bf16.msra.mxu0 %v1304_v30  ;;  %v376_v6 = vld [vmem:[#allocation10] sm:$0xff] }
  0x6a   :  { %1205 = vmatprep.subr.bf16.mxu1 %v1475_v0  ;;  %339 = vmatprep.subr.bf16.mxu0 %v1309_v31 }
  0x6d   :  { %340 = vmatpush1.bf16.msra.mxu0 %v1307_v32 }
  0x6e   :  { %1211 = vmatprep.subr.bf16.mxu0 %v1475_v0 }
 0x133   :  { %v156_v8 = vpop.f32.mrb[0].mxu0 }
 0x134   :  { %v157_v9 = vadd.f32 %v1101_v7, %v156_v8  ;;  %v1191_v10 = vpop.f32.mrb[1].mxu0 }
 0x135   :  { %v159_v11 = vpop.f32.mrb[2].mxu0 }
 0x136   :  { %v1105_v12 = vmul.f32 -1.442695, %v157_v9  ;;  %v160_v13 = vadd.f32 %v1101_v7, %v159_v11  ;;  %v1192_v14 = vpop.f32.mrb[3].mxu0 }
 0x138   :  { %1310 = vpow2.f32 %v1105_v12  ;;  %v1106_v15 = vmul.f32 -1.442695, %v160_v13 }
 0x13a   :  { %1312 = vpow2.f32 %v1106_v15 }
 0x142   :  { %v1311_v16 = vpop.eup %1310 }
 0x143   :  { %v169_v17 = vadd.f32 1.0, %v1311_v16 }
 0x144   :  { %v1313_v18 = vpop.eup %1312 }
 0x145   :  { %1314 = vrcp.f32 %v169_v17  ;;  %v170_v19 = vadd.f32 1.0, %v1313_v18 }
 0x147   :  { %1316 = vrcp.f32 %v170_v19 }
 0x14f   :  { %v1315_v20 = vpop.eup %1314 }
 0x150   :  { %v175_v22 = vmul.f32 %v1315_v20, %v157_v9  ;;  %v378_v20 = vld [vmem:[#allocation10 + $0x10] sm:$0xff] }
 0x151   :  { %v1317_v21 = vpop.eup %1316 }
 0x152   :  { %v176_v23 = vmul.f32 %v1317_v21, %v160_v13 }
 0x154   :  { %v177_v24 = vpack.c.bf16 %v176_v23, %v175_v22 }
 0x156   :  { %1202 = vmatmul.mubr.msk.bf16.vlgmr.msra.gmra.mrb[0].mxu1 %vm217_vm2, %v177_v24 }
 0x157   :  { %1207 = vmatprep.mubr.msk.bf16.mxu1 %vm1476_vm0, %v1475_v0 }
 0x229   :  { %v255_v35 = vpop.f32.mrb[0].mxu1 }
 0x22a   :  { %v256_v36 = vadd.f32 %v1107_v34, %v255_v35  ;;  %v1203_v37 = vpop.f32.mrb[1].mxu1 }
 0x22b   :  { %v258_v38 = vpop.f32.mrb[2].mxu1 }
 0x22c   :  { %v1113_v39 = vmul.f32 -1.442695, %v256_v36  ;;  %v259_v40 = vadd.f32 %v1107_v34, %v258_v38  ;;  %v1204_v41 = vpop.f32.mrb[3].mxu1 }
 0x22e   :  { %1318 = vpow2.f32 %v1113_v39  ;;  %v1114_v42 = vmul.f32 -1.442695, %v259_v40 }
 0x230   :  { %1320 = vpow2.f32 %v1114_v42 }
 0x238   :  { %v1319_v43 = vpop.eup %1318 }
 0x239   :  { %v268_v44 = vadd.f32 1.0, %v1319_v43 }
 0x23a   :  { %v1321_v45 = vpop.eup %1320 }
 0x23b   :  { %1322 = vrcp.f32 %v268_v44  ;;  %v269_v46 = vadd.f32 1.0, %v1321_v45 }
 0x23d   :  { %1324 = vrcp.f32 %v269_v46 }
 0x245   :  { %v1323_v47 = vpop.eup %1322 }
 0x246   :  { %v274_v48 = vmul.f32 %v1323_v47, %v256_v36 }
 0x247   :  { %v1325_v49 = vpop.eup %1324 }
 0x248   :  { %v1146_v50 = vpack.c.bf16 %v274_v48, %v274_v48  ;;  %v275_v51 = vmul.f32 %v1325_v49, %v259_v40 }
 0x24a   :  { %v276_v52 = vpack.c.bf16 %v275_v51, %v274_v48  ;;  %v1147_v53 = vpack.c.bf16 %v275_v51, %v275_v51  ;;  %v1629_v54 = vsel %vm217_vm2, %v1146_v50, 0 }
 0x24b   :  { %1206 = vmatpush3.bf16.xpose.msra.mxu1 %v1629_v54 }
 0x24c   :  { %1125 = vmatmul.mubr.msk.bf16.vlgmr.msra.gmra.mrb[4].mxu0 %vm217_vm2, %v276_v52  ;;  %v436_v55 = vsel %vm217_vm2, %v1147_v53, 0  ;;  %1217 = vmatprep.subr.bf16.mxu1 %v1475_v0 }
 0x24d   :  { %1212 = vmatpush3.bf16.xpose.msra.mxu0 %v436_v55  ;;  %1213 = vmatprep.mubr.msk.bf16.mxu0 %vm1476_vm0, %v1475_v0 }
 0x24e   :  { %1223 = vmatprep.subr.bf16.mxu0 %v1475_v0 }
 0x31f   :  { %v367_v56 = vpop.f32.mrb[4].mxu0 }
 0x320   :  { %v1148_v57 = vpack.c.bf16 %v367_v56, %v367_v56  ;;  %v369_v58 = vpop.f32.mrb[5].mxu0 }
 0x321   :  { %v1150_v59 = vpack.c.bf16 %v369_v58, %v369_v58  ;;  %v371_v60 = vpop.f32.mrb[6].mxu0 }
 0x322   :  { %v1149_v61 = vpack.c.bf16 %v371_v60, %v371_v60  ;;  %478 = vrot.lane.b32.xlu0 %v1148_v57, %s1468_s13  ;;  %v373_v62 = vpop.f32.mrb[7].mxu0  ;;  %1208 = vmatmul.mubr.msk.bf16.vlgmr.msra.gmra.mrb[4].mxu1 %vm217_vm2, %v1148_v57 }
 0x323   :  { %1218 = vmatpush3.bf16.xpose.msra.mxu1 %v1629_v54  ;;  %906 = vrot.lane.b32.xlu1 %v1150_v59, %s1468_s13  ;;  %v1151_v63 = vpack.c.bf16 %v373_v62, %v373_v62 }
 0x324   :  { %1214 = vmatmul.mubr.msk.bf16.vlgmr.msra.gmra.mrb[8].mxu0 %vm217_vm2, %v1149_v61  ;;  %1219 = vmatprep.mubr.msk.bf16.mxu1 %vm1476_vm0, %v1475_v0 }
 0x325   :  { %1224 = vmatpush3.bf16.xpose.msra.mxu0 %v436_v55  ;;  %1225 = vmatprep.mubr.msk.bf16.mxu0 %vm1476_vm0, %v1475_v0 }
 0x326   :  { %523 = vrot.lane.b32.xlu0 %v1149_v61, %s1468_s13  ;;  %1239 = vmatprep.subr.bf16.mxu0 %v1475_v0 }
 0x327   :  { %951 = vrot.lane.b32.xlu1 %v1151_v63, %s1468_s13  ;;  %1229 = vmatprep.subr.mxu1 %v377_v1  ;;  %s1087_s13 = sshll.u32 %s1478_s4, 4  ;;  %s1088_s13 = int_to_ptr.vmem [resolvable:$true] %s1087_s13 }
 0x328   :  { %s1436_s20 = scalar_lea.vmem %s1088_s13, 256  ;;  %p1441_p13 = scmp.lt.s32.totalorder %s1088_s13, %s1088_s13 }
 0x329   :  { %p1437_p12 = scmp.ne.s32.totalorder %s1088_s13, %s1436_s20  ;;  %p1442_p0 = scmp.lt.s32.totalorder %s1436_s20, %s1436_s20 }
 0x32b   :  { %p1443_p1 = por %p1442_p0, %p1441_p13 }
 0x32d   :  { %p1444_p2 = pnand %p1443_p1, %p1437_p12 }
 0x394   :  { %v479_v2 = vpop.permute.xlu0 %478 }
 0x395   :  { %1220 = vmatmul.mubr.msk.bf16.vlgmr.msra.gmra.mrb[8].mxu1 %vm217_vm2, %v479_v2  ;;  %v907_v4 = vpop.permute.xlu1 %906 }
 0x396   :  { %1230 = vmatpush3.msra.mxu1 %v377_v1 }
 0x397   :  { %1234 = vmatprep.subr.mxu1 %v376_v6 }
 0x398   :  { %v524_v3 = vpop.permute.xlu0 %523 }
 0x399   :  { %1226 = vmatmul.mubr.msk.bf16.vlgmr.msra.gmra.mrb[12].mxu0 %vm217_vm2, %v524_v3  ;;  %v952_v5 = vpop.permute.xlu1 %951 }
 0x39a   :  { %1240 = vmatpush3.bf16.xpose.msra.mxu0 %v1629_v54  ;;  %1241 = vmatprep.mubr.msk.bf16.mxu0 %vm1476_vm0, %v1475_v0 }
 0x39b   :  { %1245 = vmatprep.subr.bf16.mxu0 %v1475_v0 }
 0x3a1   :  { %1242 = vmatmul.mubr.msk.bf16.vlgmr.msra.gmra.mrb[16].mxu0 %vm217_vm2, %v1150_v59 }
 0x3a2   :  { %1246 = vmatpush3.bf16.xpose.msra.mxu0 %v436_v55  ;;  %1247 = vmatprep.mubr.msk.bf16.mxu0 %vm1476_vm0, %v1475_v0 }
 0x3a3   :  { %1262 = vmatprep.subr.bf16.mxu0 %v1475_v0 }
 0x3a9   :  { %1248 = vmatmul.mubr.msk.bf16.vlgmr.msra.gmra.mrb[20].mxu0 %vm217_vm2, %v1151_v63 }
 0x3aa   :  { %1263 = vmatpush3.bf16.xpose.msra.mxu0 %v436_v55  ;;  %1264 = vmatprep.mubr.msk.bf16.mxu0 %vm1476_vm0, %v1475_v0 }
 0x3b1   :  { %1265 = vmatmul.mubr.msk.bf16.vlgmr.msra.gmra.mrb[24].mxu0 %vm217_vm2, %v952_v5 }
 0x3f5   :  { %v426_v7 = vpop.f32.mrb[4].mxu1 }
 0x3f6   :  { %v1209_v8 = vpop.f32.mrb[5].mxu1 }
 0x3f7   :  { %v429_v9 = vpop.f32.mrb[6].mxu1  ;;  %v472_v10 = vpop.f32.mrb[8].mxu0 }
 0x3f8   :  { %v1210_v11 = vpop.f32.mrb[7].mxu1  ;;  %v1215_v12 = vpop.f32.mrb[9].mxu0 }
 0x3f9   :  { %v475_v13 = vpop.f32.mrb[10].mxu0 }
 0x3fa   :  { %v1216_v14 = vpop.f32.mrb[11].mxu0 }
 0x468   :  { %v517_v15 = vpop.f32.mrb[8].mxu1 }
 0x469   :  { %v1221_v16 = vpop.f32.mrb[9].mxu1  ;;  %1231 = vmatprep.mubr.msk.f32.mxu1 %vm568_vm3, %v517_v15 }
 0x46a   :  { %v520_v17 = vpop.f32.mrb[10].mxu1 }
 0x46b   :  { %v1222_v18 = vpop.f32.mrb[11].mxu1 }
 0x46c   :  { %v562_v19 = vpop.f32.mrb[12].mxu0 }
 0x46d   :  { %v1227_v21 = vpop.f32.mrb[13].mxu0  ;;  %1232 = vmatmul.mubr.msk.f32.vlgmr.msra.gmra.mrb[12].mxu1 %vm568_vm3, %v562_v19 }
 0x46e   :  { %1235 = vmatpush3.msra.mxu1 %v376_v6  ;;  %v565_v22 = vpop.f32.mrb[14].mxu0  ;;  %1236 = vmatprep.mubr.msk.f32.mxu1 %vm568_vm3, %v426_v7 }
 0x46f   :  { %v1228_v23 = vpop.f32.mrb[15].mxu0  ;;  %1251 = vmatprep.subr.mxu1 %v378_v20 }
 0x474   :  { %v774_v24 = vpop.f32.mrb[16].mxu0 }
 0x475   :  { %1237 = vmatmul.mubr.msk.f32.vlgmr.msra.gmra.mrb[12].mxu1 %vm568_vm3, %v472_v10  ;;  %v1243_v25 = vpop.f32.mrb[17].mxu0 }
 0x476   :  { %1252 = vmatpush3.msra.mxu1 %v378_v20  ;;  %v777_v26 = vpop.f32.mrb[18].mxu0  ;;  %1253 = vmatprep.mubr.msk.f32.mxu1 %vm568_vm3, %v774_v24 }
 0x477   :  { %v1244_v27 = vpop.f32.mrb[19].mxu0  ;;  %1256 = vmatprep.subr.bf16.mxu1 %v1475_v0 }
 0x47c   :  { %v817_v28 = vpop.f32.mrb[20].mxu0 }
 0x47d   :  { %v1249_v30 = vpop.f32.mrb[21].mxu0  ;;  %1254 = vmatmul.mubr.msk.f32.vlgmr.msra.gmra.mrb[12].mxu1 %vm568_vm3, %v817_v28 }
 0x47e   :  { %1257 = vmatpush3.bf16.xpose.msra.mxu1 %v1629_v54  ;;  %v820_v31 = vpop.f32.mrb[22].mxu0  ;;  %1258 = vmatprep.mubr.msk.bf16.mxu1 %vm1476_vm0, %v1475_v0 }
 0x47f   :  { %v1250_v32 = vpop.f32.mrb[23].mxu0  ;;  %1268 = vmatprep.subr.mxu1 %v379_v29 }
 0x484   :  { %v990_v33 = vpop.f32.mrb[24].mxu0 }
 0x485   :  { %1259 = vmatmul.mubr.msk.bf16.vlgmr.msra.gmra.mrb[16].mxu1 %vm217_vm2, %v907_v4  ;;  %v1266_v34 = vpop.f32.mrb[25].mxu0 }
 0x486   :  { %v993_v35 = vpop.f32.mrb[26].mxu0  ;;  %1269 = vmatpush3.msra.mxu1 %v379_v29 }
 0x487   :  { %v1267_v36 = vpop.f32.mrb[27].mxu0 }
 0x558   :  { %v945_v37 = vpop.f32.mrb[16].mxu1 }
 0x559   :  { %v1260_v38 = vpop.f32.mrb[17].mxu1  ;;  %1270 = vmatprep.mubr.msk.f32.mxu1 %vm568_vm3, %v945_v37 }
 0x55a   :  { %v948_v39 = vpop.f32.mrb[18].mxu1  ;;  %1271 = vmatmul.mubr.msk.f32.vlgmr.msra.gmra.mrb[12].mxu1 %vm568_vm3, %v990_v33 }
 0x55b   :  { %v1261_v40 = vpop.f32.mrb[19].mxu1 }
 0x62d   :  { %v1272_v0 = vpop.f32.mrb[12].mxu1 }
 0x62e   :  { %1081 = vst.msk [vmem:[#allocation11 + $0x8] sm:$0xff] %vm1079_vm4, %v1272_v0  ;;  %v1068_v41 = vpop.f32.mrb[13].mxu1 }
 0x62f   :  { %1080 = vst.msk [vmem:[#allocation11] sm:$0xff] %vm1079_vm4, %v1068_v41 }
 0x630   :  { %1447 = shalt.err (!%p1444_p2)
}
 0x631   :  { %s1448_s23 = scalar_lea.hbm %s1699_s7, 256 }
 0x632   :  { %p1449_p3 = scmp.ne.s32.totalorder %s1699_s7, %s1448_s23  ;;  %p1452_p4 = scmp.lt.u32.totalorder %s1448_s23, %s1699_s7 }
 0x634   :  { %p1454_p5 = pnand %p1452_p4, %p1449_p3 }
 0x636   :  { %1457 = shalt.err (!%p1454_p5)
}
 0x637   :  { %1093 = dma.vmem_to_hbm [thread:$0]  %s1088_s13, 256, %s1699_s7, [#allocation4], %s1470_s1, %s1470_s1, %s1471_s25  }
 0x638   :  { %1464 = dma.done.wait [#allocation4], 256  }
 0x639   :  { %1465 = vsyncadd [#allocation4], 4294967040 }
 0x63a   :  { %1097 = vsyncpa [#allocation3], 1 }
 0x63b   :  { %1098 = vsyncpa [#allocation6], 1 }
 0x63c   :  { %1099 = vsyncpa [#allocation9], 1 }
 0x63d   :  { %1100 = vsyncpa [#allocation4], 1 }

</bundles_post_ra>
